<compile_context>
chip_gen: v7x
topology: tpu7x:2x2x1
jax: 0.10.0
libtpu: 0.0.40
codegen_flags: <defaults>
</compile_context>

<pallas_src>
import math

import jax
import jax.numpy as jnp
from jax.experimental import pallas as pl
from jax.experimental.pallas import tpu as pltpu


def _round_up(x: int, m: int) -> int:
    return ((x + m - 1) // m) * m


# ----------------------------------------------------------------------------
# One-time parameter preparation (hoisted out of the per-call wrapper).
# ----------------------------------------------------------------------------
def prepare_duration_embedder_params(pos_weights, lin_w, lin_b,
                                      *, fourier_dtype=jnp.bfloat16):
    """pos_weights: [half]            StableAudioPositionalEmbedding.weights
       lin_w      : [D, 2*half + 1]   PyTorch nn.Linear weight (out, in)
       lin_b      : [D]               PyTorch nn.Linear bias
       fourier_dtype: dtype for the fourier weight block fed to the MXU
                      (bf16 halves HBM bytes; f32 for bit-faithful results).
    Returns a dict of kernel-ready (transposed / packed / lane-padded) arrays."""
    half = pos_weights.shape[0]
    D = lin_w.shape[0]
    assert lin_w.shape[1] == 2 * half + 1, (lin_w.shape, half)
    two_half = 2 * half

    K_pad = _round_up(two_half, 128)      # MXU contraction dim (zero-padded rows)
    D_pad = _round_up(D, 128)             # lane-dense output width (zero-padded cols)
    N = max(K_pad, D_pad)                 # width of the packed row buffer

    # PyTorch computes x @ W.T + b with W [out, in]; kernel uses W.T [in, out].
    w_T = jnp.transpose(lin_w).astype(jnp.float32)            # [2*half + 1, D]
    w_t_row = w_T[0]                                           # [D]  raw-time row
    w_fourier = w_T[1:]                                        # [2*half, D] sin|cos rows
    w_fourier = jnp.pad(w_fourier,
                        ((0, K_pad - two_half), (0, D_pad - D))
                        ).astype(fourier_dtype)                # [K_pad, D_pad]

    # Row 0: [posw, posw] * 2*pi    Row 1: +pi/2 phase on the cos half
    # Row 2: raw-time weight row    Row 3: bias
    two_pi = 2.0 * math.pi
    posw2 = jnp.concatenate([pos_weights, pos_weights]).astype(jnp.float32) * two_pi
    phase = jnp.concatenate([jnp.zeros((half,), jnp.float32),
                             jnp.full((half,), 0.5 * math.pi, jnp.float32)])

    def _row(v):
        v = v.astype(jnp.float32)
        return jnp.pad(v, (0, N - v.shape[0]))

    rows = jnp.stack([_row(posw2), _row(phase),
                      _row(w_t_row), _row(lin_b)], axis=0)     # [4, N]

    return {
        "rows": rows,
        "w_fourier": w_fourier,
        "half": half,
        "D": D,
        "D_pad": D_pad,
        "K_pad": K_pad,
        "N": N,
    }


# ----------------------------------------------------------------------------
# Kernel
# ----------------------------------------------------------------------------
def make_duration_embedder_kernel(min_value: float, max_value: float,
                                  k_pad: int, d_pad: int):
    assert max_value > min_value, "max_value must be > min_value"
    inv_range = 1.0 / (max_value - min_value)

    def kernel(floats_ref, rows_ref, w_fourier_ref, out_ref):
        # floats_ref   : [B, 1]            duration scalars
        # rows_ref     : [4, N]            packed (posw2 | phase | w_t | bias) rows
        # w_fourier_ref: [K_pad, D_pad]    Linear rows for [sin | cos] (maybe bf16)
        # out_ref      : [B, D_pad]
        t = floats_ref[...]                                    # [B, 1]
        t = jnp.clip(t, min_value, max_value)
        t = (t - min_value) * inv_range                        # normalized to [0, 1]

        posw2 = rows_ref[0:1, :k_pad]                          # [1, K_pad]
        phase = rows_ref[1:2, :k_pad]                          # [1, K_pad]
        w_t = rows_ref[2:3, :d_pad]                            # [1, D_pad]
        bias = rows_ref[3:4, :d_pad]                           # [1, D_pad]

        # Fused fourier features: sin on the first half, cos via +pi/2 phase on the
        # second half, exact zeros in the K padding (phase = 0 there).
        fouriered = jnp.sin(t * posw2 + phase)                 # [B, K_pad]

        # Accumulator init = bias + raw-time term (VPU); fourier block on the MXU.
        acc = bias + t * w_t                                   # [B, D_pad]
        acc = acc + jnp.dot(fouriered.astype(w_fourier_ref.dtype),
                            w_fourier_ref[...],
                            preferred_element_type=jnp.float32)
        out_ref[...] = acc.astype(out_ref.dtype)

    return kernel


# ----------------------------------------------------------------------------
# Wrapper
# ----------------------------------------------------------------------------
def duration_embedder_forward(floats, params, *, min_value: float, max_value: float):
    """floats: [B] durations.  params: output of prepare_duration_embedder_params.
    Returns [B, 1, D] float32."""
    B = floats.shape[0]
    D, D_pad, K_pad = params["D"], params["D_pad"], params["K_pad"]
    rows, w_fourier = params["rows"], params["w_fourier"]

    floats_2d = floats.reshape(B, 1).astype(jnp.float32)
    kernel = make_duration_embedder_kernel(float(min_value), float(max_value),
                                           K_pad, D_pad)

    w_bytes = w_fourier.size * jnp.dtype(w_fourier.dtype).itemsize
    cost = pl.CostEstimate(
        flops=2 * B * K_pad * D_pad + 4 * B * D_pad + 2 * B * K_pad,
        transcendentals=B * K_pad,
        bytes_accessed=floats_2d.size * 4 + rows.size * 4 + w_bytes + B * D_pad * 4,
    )

    out = pl.pallas_call(
        kernel,
        out_shape=jax.ShapeDtypeStruct((B, D_pad), jnp.float32),
        in_specs=[
            pl.BlockSpec(memory_space=pltpu.MemorySpace.VMEM),  # floats    [B, 1]
            pl.BlockSpec(memory_space=pltpu.MemorySpace.VMEM),  # rows      [4, N]
            pl.BlockSpec(memory_space=pltpu.MemorySpace.VMEM),  # w_fourier [K_pad, D_pad]
        ],
        out_specs=pl.BlockSpec(memory_space=pltpu.MemorySpace.VMEM),
        cost_estimate=cost,
    )(floats_2d, rows, w_fourier)

    if D_pad != D:
        # Only hit when number_embedding_dim is not a multiple of 128; padded
        # columns are exact zeros.  Prefer lane-aligned D to skip this XLA copy.
        out = out[:, :D]
    # .view(-1, 1, number_embedding_dim)
    # TODO(synk): for batches in the thousands, add a 1-D "parallel" grid over B
    # (blocks >= 256 rows, weight index_map constant) to use v7x's second TC.
    return out.reshape(-1, 1, D)


# ----------------------------------------------------------------------------
# Pure-JAX reference (mirrors the PyTorch module) for correctness checking.
# ----------------------------------------------------------------------------
def duration_embedder_reference(floats, pos_weights, lin_w, lin_b,
                                *, min_value: float, max_value: float):
    t = jnp.clip(floats, min_value, max_value)
    t = (t - min_value) / (max_value - min_value)
    t = t[..., None]                                           # [B, 1]
    freqs = t * pos_weights[None, :] * 2.0 * math.pi           # [B, half]
    fouriered = jnp.concatenate([jnp.sin(freqs), jnp.cos(freqs)], axis=-1)
    feats = jnp.concatenate([t, fouriered], axis=-1)           # [B, 2*half + 1]
    emb = feats @ lin_w.T + lin_b                              # [B, D]
    return emb.reshape(-1, 1, lin_b.shape[0])


if __name__ == "__main__":
    # Small, deterministic synthetic configuration (module default internal_dim).
    B = 8                        # batch of duration scalars (multiple of 8 sublanes)
    internal_dim = 256           # module default; must be even
    number_embedding_dim = 128   # multiple of 128 -> no post-kernel slice
    min_value, max_value = 0.0, 30.0
    half = internal_dim // 2

    key = jax.random.PRNGKey(0)
    k1, k2, k3, k4 = jax.random.split(key, 4)

    # Module __init__ shapes:
    #   StableAudioPositionalEmbedding.weights : [internal_dim // 2]
    #   Linear.weight : [number_embedding_dim, internal_dim + 1]
    #   Linear.bias   : [number_embedding_dim]
    pos_weights = jax.random.normal(k1, (half,), dtype=jnp.float32)
    lin_w = jax.random.normal(k2, (number_embedding_dim, internal_dim + 1),
                              dtype=jnp.float32) * 0.05
    lin_b = jax.random.normal(k3, (number_embedding_dim,), dtype=jnp.float32) * 0.05

    # Example durations (some outside [min, max] to exercise the clamp).
    floats = jax.random.uniform(k4, (B,), dtype=jnp.float32,
                                minval=-5.0, maxval=40.0)

    ref = duration_embedder_reference(
        floats, pos_weights, lin_w, lin_b,
        min_value=min_value, max_value=max_value)
    ref = jax.block_until_ready(ref)

    # --- f32 fourier weights: bit-faithful path --------------------------------
    params_f32 = prepare_duration_embedder_params(
        pos_weights, lin_w, lin_b, fourier_dtype=jnp.float32)
    out_f32 = duration_embedder_forward(
        floats, params_f32, min_value=min_value, max_value=max_value)
    out_f32 = jax.block_until_ready(out_f32)

    assert out_f32.shape == (B, 1, number_embedding_dim), out_f32.shape
    assert jnp.allclose(out_f32, ref, atol=1e-4, rtol=1e-4), \
        f"f32 path max abs err = {jnp.max(jnp.abs(out_f32 - ref))}"

    # --- bf16 fourier weights: halved HBM transfer, native MXU path ------------
    params_bf16 = prepare_duration_embedder_params(
        pos_weights, lin_w, lin_b, fourier_dtype=jnp.bfloat16)
    out_bf16 = duration_embedder_forward(
        floats, params_bf16, min_value=min_value, max_value=max_value)
    out_bf16 = jax.block_until_ready(out_bf16)

    assert out_bf16.shape == (B, 1, number_embedding_dim), out_bf16.shape
    assert jnp.allclose(out_bf16, ref, atol=2e-2, rtol=2e-2), \
        f"bf16 path max abs err = {jnp.max(jnp.abs(out_bf16 - ref))}"

    print("KERNEL_OK")
</pallas_src>

<mosaic_0001>
module attributes {stable_mosaic.version = 11 : i64} {
  func.func @kernel(%arg0: memref<8x1xf32, #tpu.memory_space<vmem>>, %arg1: memref<4x256xf32, #tpu.memory_space<vmem>>, %arg2: memref<256x128xf32, #tpu.memory_space<vmem>>, %arg3: memref<8x128xf32, #tpu.memory_space<vmem>>) attributes {dimension_semantics = [], scalar_prefetch = 0 : i64, scratch_operands = 0 : i64, tpu.core_type = #tpu.core_type<tc>} {
    %c0 = arith.constant 0 : index
    %c0_0 = arith.constant 0 : index
    %0 = vector.load %arg0[%c0, %c0_0] : memref<8x1xf32, #tpu.memory_space<vmem>>, vector<8x1xf32>
    %cst = arith.constant 0.000000e+00 : f32
    %cst_1 = arith.constant 3.000000e+01 : f32
    %1 = vector.broadcast %cst : f32 to vector<8x1xf32>
    %2 = arith.maximumf %1, %0 : vector<8x1xf32>
    %3 = vector.broadcast %cst_1 : f32 to vector<8x1xf32>
    %4 = arith.minimumf %3, %2 : vector<8x1xf32>
    %cst_2 = arith.constant 0.000000e+00 : f32
    %5 = vector.broadcast %cst_2 : f32 to vector<8x1xf32>
    %6 = arith.subf %4, %5 : vector<8x1xf32>
    %cst_3 = arith.constant 0.0333333351 : f32
    %7 = vector.broadcast %cst_3 : f32 to vector<8x1xf32>
    %8 = arith.mulf %6, %7 : vector<8x1xf32>
    %c0_4 = arith.constant 0 : index
    %c0_5 = arith.constant 0 : index
    %9 = vector.load %arg1[%c0_4, %c0_5] : memref<4x256xf32, #tpu.memory_space<vmem>>, vector<1x256xf32>
    %c1 = arith.constant 1 : index
    %c0_6 = arith.constant 0 : index
    %10 = vector.load %arg1[%c1, %c0_6] : memref<4x256xf32, #tpu.memory_space<vmem>>, vector<1x256xf32>
    %c2 = arith.constant 2 : index
    %c0_7 = arith.constant 0 : index
    %11 = vector.load %arg1[%c2, %c0_7] : memref<4x256xf32, #tpu.memory_space<vmem>>, vector<1x128xf32>
    %c3 = arith.constant 3 : index
    %c0_8 = arith.constant 0 : index
    %12 = vector.load %arg1[%c3, %c0_8] : memref<4x256xf32, #tpu.memory_space<vmem>>, vector<1x128xf32>
    %13 = vector.broadcast %8 : vector<8x1xf32> to vector<8x256xf32>
    %14 = vector.broadcast %9 : vector<1x256xf32> to vector<8x256xf32>
    %15 = arith.mulf %13, %14 : vector<8x256xf32>
    %16 = vector.broadcast %10 : vector<1x256xf32> to vector<8x256xf32>
    %17 = arith.addf %15, %16 : vector<8x256xf32>
    %18 = math.sin %17 : vector<8x256xf32>
    %19 = vector.broadcast %8 : vector<8x1xf32> to vector<8x128xf32>
    %20 = vector.broadcast %11 : vector<1x128xf32> to vector<8x128xf32>
    %21 = arith.mulf %19, %20 : vector<8x128xf32>
    %22 = vector.broadcast %12 : vector<1x128xf32> to vector<8x128xf32>
    %23 = arith.addf %22, %21 : vector<8x128xf32>
    %c0_9 = arith.constant 0 : index
    %c0_10 = arith.constant 0 : index
    %24 = vector.load %arg2[%c0_9, %c0_10] : memref<256x128xf32, #tpu.memory_space<vmem>>, vector<256x128xf32>
    %cst_11 = arith.constant dense<0.000000e+00> : vector<8x128xf32>
    %25 = tpu.matmul %18, %24, %cst_11 {dimension_numbers = #tpu.dot_dimension_numbers<[1], [0], [0], [1], [0, 0, 1, 1], [], []>} : vector<8x256xf32>, vector<256x128xf32>, vector<8x128xf32> -> vector<8x128xf32>
    %26 = arith.addf %23, %25 : vector<8x128xf32>
    %c0_12 = arith.constant 0 : index
    %c0_13 = arith.constant 0 : index
    %27 = vector.load %arg3[%c0_12, %c0_13] : memref<8x128xf32, #tpu.memory_space<vmem>>, vector<8x128xf32>
    tpu.vector_store %arg3[%c0_12, %c0_13], %26 {strides = array<i32>} : memref<8x128xf32, #tpu.memory_space<vmem>>, vector<8x128xf32>,
    return
  }
}

</mosaic_0001>

<bundles_post_ra>
// kernel: tpu_custom_call.1
= control target key start
LH: loop header
LB: loop body
LE: loop exit
PB: predicated region body
PF: predicated region fallthrough
CT: control target
= control target key end

     0   :  { %8 = vsyncpa [#allocation3], 0  ;;  %s701_s0 = inlined_call_operand.vmem [shape: f32[8,1], index: 0, kind: input, shape index: {}]   ;;  %s702_s1 = inlined_call_operand.vmem [shape: f32[4,256], index: 1, kind: input, shape index: {}]   ;;  %s703_s2 = inlined_call_operand.hbm [shape: f32[256,128], index: 2, kind: input, shape index: {}]   ;;  %s704_s3 = inlined_call_operand.hbm [shape: f32[8,128], index: 3, kind: output, shape index: {}]  }
   0x1   :  { %9 = vsyncpa [#allocation4], 0  ;;  %s560_s12 = smov [#allocation2]   ;;  %s512_s16 = scalar_lea.hbm %s703_s2, 4096 }
   0x2   :  { %s19_s13 = sshll.u32 %s560_s12, 4  ;;  %p513_p0 = scmp.ne.s32.totalorder %s703_s2, %s512_s16  ;;  %s20_s13 = int_to_ptr.vmem [resolvable:$true] %s19_s13 }
   0x3   :  { %p516_p1 = scmp.lt.u32.totalorder %s512_s16, %s703_s2 }
   0x5   :  { %p518_p2 = pnand %p516_p1, %p513_p0 }
   0x7   :  { %521 = shalt.err (!%p518_p2)
}
   0x8   :  { %s522_s21 = scalar_lea.vmem %s20_s13, 4096  ;;  %p527_p4 = scmp.lt.s32.totalorder %s20_s13, %s20_s13 }
   0x9   :  { %p523_p3 = scmp.ne.s32.totalorder %s20_s13, %s522_s21  ;;  %p528_p5 = scmp.lt.s32.totalorder %s522_s21, %s522_s21 }
   0xb   :  { %p529_p6 = por %p528_p5, %p527_p4 }
   0xd   :  { %p530_p7 = pnand %p529_p6, %p523_p3 }
   0xf   :  { %533 = shalt.err (!%p530_p7)
}
  0x10   :  { %s561_s22 = smov 128   ;;  %s562_s23 = smov 8  }
  0x11   :  { %25 = dma.hbm_to_vmem [thread:$0]  %s703_s2, 4096, %s20_s13, [#allocation3], %s561_s22, %s561_s22, %s562_s23  }
  0x12   :  { %556 = dma.done.wait [#allocation3], 4096  }
  0x13   :  { %557 = vsyncadd [#allocation3], 4294963200  ;;  %v563_v0 = vmov 0   ;;  %v29_v1 = vld [vmem:[%s701_s0] sm:$0xff]  ;;  %v303_v5 = vld [vmem:[#allocation2 + $0x80] sm:$0xff]  ;;  %v44_v53 = vlaneseq  ;;  %s570_s7 = smov [#allocation5]  }
  0x14   :  { %503 = vset.pattern.permute.xlu0 %v563_v0  ;;  %v30_v2 = vmax.f32 %v29_v1, 0.0  ;;  %v304_v6 = vld [vmem:[#allocation2 + $0x88] sm:$0xff]  ;;  %v287_v7 = vld [vmem:[#allocation2] sm:$0xff]  ;;  %v305_v10 = vld [vmem:[#allocation2 + $0x90] sm:$0xff]  ;;  %s397_s8 = sshll.u32 %s570_s7, 4  ;;  %s398_s8 = int_to_ptr.vmem [resolvable:$true] %s397_s8 }
  0x15   :  { %v452_v8 = vpack.c.bf16 %v304_v6, %v303_v5  ;;  %v288_v9 = vld [vmem:[#allocation2 + $0x8] sm:$0xff]  ;;  %v306_v11 = vld [vmem:[#allocation2 + $0x98] sm:$0xff]  ;;  %v289_v14 = vld [vmem:[#allocation2 + $0x10] sm:$0xff]  ;;  %v45_v54 = vshrl.u32 %v44_v53, 7  ;;  %s534_s9 = scalar_lea.vmem %s398_s8, 128  ;;  %p539_p9 = scmp.lt.s32.totalorder %s398_s8, %s398_s8 }
  0x16   :  { %v31_v3 = vmin.f32 %v30_v2, 30.0  ;;  %v454_v12 = vpack.c.bf16 %v288_v9, %v287_v7  ;;  %v456_v13 = vpack.c.bf16 %v306_v11, %v305_v10  ;;  %v290_v15 = vld [vmem:[#allocation2 + $0x18] sm:$0xff]  ;;  %v307_v16 = vld [vmem:[#allocation2 + $0xa0] sm:$0xff]  ;;  %v308_v17 = vld [vmem:[#allocation2 + $0xa8] sm:$0xff]  ;;  %p535_p8 = scmp.ne.s32.totalorder %s398_s8, %s534_s9  ;;  %p540_p10 = scmp.lt.s32.totalorder %s534_s9, %s534_s9 }
  0x17   :  { %453 = vmatprep.subr.bf16.mxu0 %v452_v8  ;;  %v458_v18 = vpack.c.bf16 %v290_v15, %v289_v14  ;;  %v460_v19 = vpack.c.bf16 %v308_v17, %v307_v16  ;;  %v291_v20 = vld [vmem:[#allocation2 + $0x20] sm:$0xff]  ;;  %v292_v21 = vld [vmem:[#allocation2 + $0x28] sm:$0xff]  ;;  %v309_v22 = vld [vmem:[#allocation2 + $0xb0] sm:$0xff]  ;;  %v46_v55 = vsub.s32 0, %v45_v54  ;;  %v50_v56 = vsub.s32 1, %v45_v54 }
  0x18   :  { %v32_v4 = vmul.f32 0.033333335, %v31_v3  ;;  %455 = vmatpush3.bf16.msra.mxu0 %v454_v12  ;;  %v310_v23 = vld [vmem:[#allocation2 + $0xb8] sm:$0xff]  ;;  %v462_v24 = vpack.c.bf16 %v292_v21, %v291_v20  ;;  %v293_v26 = vld [vmem:[#allocation2 + $0x30] sm:$0xff]  ;;  %v311_v28 = vld [vmem:[#allocation2 + $0xc0] sm:$0xff]  ;;  %p541_p11 = por %p540_p10, %p539_p9 }
  0x19   :  { %457 = vmatprep.subr.bf16.mxu0 %v456_v13  ;;  %v464_v25 = vpack.c.bf16 %v310_v23, %v309_v22  ;;  %v294_v27 = vld [vmem:[#allocation2 + $0x38] sm:$0xff]  ;;  %v312_v29 = vld [vmem:[#allocation2 + $0xc8] sm:$0xff]  ;;  %v295_v32 = vld [vmem:[#allocation2 + $0x40] sm:$0xff] }
  0x1a   :  { %40 = vperm.xlu0 %503, %v32_v4   ;;  %v466_v30 = vpack.c.bf16 %v294_v27, %v293_v26  ;;  %v468_v31 = vpack.c.bf16 %v312_v29, %v311_v28  ;;  %v296_v33 = vld [vmem:[#allocation2 + $0x48] sm:$0xff]  ;;  %v313_v34 = vld [vmem:[#allocation2 + $0xd0] sm:$0xff]  ;;  %v314_v35 = vld [vmem:[#allocation2 + $0xd8] sm:$0xff]  ;;  %v564_v28 = vmov 683565275   ;;  %p542_p12 = pnand %p541_p11, %p535_p8 }
  0x1b   :  { %v470_v36 = vpack.c.bf16 %v296_v33, %v295_v32  ;;  %v472_v37 = vpack.c.bf16 %v314_v35, %v313_v34  ;;  %v297_v38 = vld [vmem:[#allocation2 + $0x50] sm:$0xff]  ;;  %v298_v39 = vld [vmem:[#allocation2 + $0x58] sm:$0xff]  ;;  %v315_v40 = vld [vmem:[#allocation2 + $0xe0] sm:$0xff]  ;;  %v566_v32 = vmov 2131351028  }
  0x1c   :  { %459 = vmatpush3.bf16.msra.mxu0 %v458_v18  ;;  %v316_v41 = vld [vmem:[#allocation2 + $0xe8] sm:$0xff]  ;;  %v474_v42 = vpack.c.bf16 %v298_v39, %v297_v38  ;;  %v299_v44 = vld [vmem:[#allocation2 + $0x60] sm:$0xff]  ;;  %v317_v46 = vld [vmem:[#allocation2 + $0xf0] sm:$0xff]  ;;  %v568_v39 = vmov 920167782  }
  0x1d   :  { %461 = vmatprep.subr.bf16.mxu0 %v460_v19  ;;  %v476_v43 = vpack.c.bf16 %v316_v41, %v315_v40  ;;  %v300_v45 = vld [vmem:[#allocation2 + $0x68] sm:$0xff]  ;;  %v318_v47 = vld [vmem:[#allocation2 + $0xf8] sm:$0xff]  ;;  %v301_v50 = vld [vmem:[#allocation2 + $0x70] sm:$0xff] }
  0x1e   :  { %v478_v48 = vpack.c.bf16 %v300_v45, %v299_v44  ;;  %v480_v49 = vpack.c.bf16 %v318_v47, %v317_v46  ;;  %v302_v51 = vld [vmem:[#allocation2 + $0x78] sm:$0xff]  ;;  %v33_v57 = vld [vmem:[%s702_s1] ss:$4 sm:$0x3] }
  0x1f   :  { %v482_v52 = vpack.c.bf16 %v302_v51, %v301_v50  ;;  %v406_v58 = vld [vmem:[%s702_s1 + $0x1] ss:$4 sm:$0x3]  ;;  %v47_v59 = vrot.slane %v33_v57, %v46_v55  ;;  %v51_v60 = vrot.slane %v33_v57, %v50_v56 }
  0x20   :  { %463 = vmatpush3.bf16.msra.mxu0 %v462_v24  ;;  %v60_v61 = vrot.slane %v406_v58, %v46_v55  ;;  %v64_v62 = vrot.slane %v406_v58, %v50_v56 }
  0x21   :  { %465 = vmatprep.subr.bf16.mxu0 %v464_v25 }
  0x24   :  { %467 = vmatpush3.bf16.msra.mxu0 %v466_v30  ;;  %v565_v30 = vmov 2475754826  }
  0x25   :  { %469 = vmatprep.subr.bf16.mxu0 %v468_v31 }
  0x28   :  { %471 = vmatpush3.bf16.msra.mxu0 %v470_v36  ;;  %v567_v36 = vmov 2102212464  }
  0x29   :  { %473 = vmatprep.subr.bf16.mxu0 %v472_v37 }
  0x2c   :  { %475 = vmatpush3.bf16.msra.mxu0 %v474_v42  ;;  %v569_v42 = vmov 1326507024  }
  0x2d   :  { %477 = vmatprep.subr.bf16.mxu0 %v476_v43 }
  0x30   :  { %479 = vmatpush3.bf16.msra.mxu0 %v478_v48 }
  0x31   :  { %481 = vmatprep.subr.bf16.mxu0 %v480_v49 }
  0x34   :  { %483 = vmatpush3.bf16.msra.mxu0 %v482_v52 }
  0x99   :  { %v612_v63 = vpop.permute.xlu0 %40 }
  0x9a   :  { %v54_v0 = vmul.f32 %v47_v59, %v612_v63  ;;  %v55_v1 = vmul.f32 %v51_v60, %v612_v63 }
  0x9c   :  { %v616_v2 = vadd.f32 %v60_v61, %v54_v0  ;;  %v618_v3 = vadd.f32 %v64_v62, %v55_v1 }
  0x9e   :  { %v72_v4 = vand.u32 2139095040, %v616_v2  ;;  %v176_v5 = vand.u32 2139095040, %v618_v3  ;;  %v173_v6 = vand.u32 2147483647, %v618_v3  ;;  %v69_v7 = vand.u32 2147483647, %v616_v2 }
  0x9f   :  { %vm175_vm14 = vcmp.lt.s32.totalorder %v618_v3, 0 }
  0xa0   :  { %v73_v8 = vshrl.u32 %v72_v4, 23  ;;  %v177_v9 = vshrl.u32 %v176_v5, 23  ;;  %v180_v12 = vand.u32 8388607, %v173_v6  ;;  %v76_v13 = vand.u32 8388607, %v69_v7 }
  0xa1   :  { %vm174_vm15 = vcmp.le.f32.partialorder %v173_v6, 0.7853982 }
  0xa2   :  { %v407_v10 = vadd.s32 4294967169, %v73_v8  ;;  %v411_v11 = vadd.s32 4294967169, %v177_v9  ;;  %v181_v16 = vor.u32 8388608, %v180_v12  ;;  %v77_v17 = vor.u32 8388608, %v76_v13 }
  0xa4   :  { %v79_v14 = vadd.s32 1, %v407_v10  ;;  %v183_v15 = vadd.s32 1, %v411_v11  ;;  %v632_v25 = vshll.u32 %v181_v16, 8  ;;  %v634_v26 = vshll.u32 %v77_v17, 8 }
  0xa6   :  { %vm80_vm0 = vcmp.gt.s32.totalorder %v79_v14, 0  ;;  %vm184_vm1 = vcmp.gt.s32.totalorder %v183_v15, 0 }
  0xa7   :  { %v81_v18 = vsel %vm80_vm0, %v79_v14, 0  ;;  %v185_v19 = vsel %vm184_vm1, %v183_v15, 0  ;;  %vm71_vm0 = vcmp.lt.s32.totalorder %v616_v2, 0  ;;  %vm70_vm1 = vcmp.le.f32.partialorder %v69_v7, 0.7853982 }
  0xa8   :  { %v628_v20 = vand.u32 31, %v81_v18  ;;  %v187_v21 = vand.u32 31, %v185_v19  ;;  %v186_v22 = vshrl.u32 %v185_v19, 5  ;;  %v630_v23 = vshrl.u32 %v81_v18, 5 }
  0xaa   :  { %v188_v24 = vsub.s32 32, %v187_v21  ;;  %v84_v27 = vsub.s32 32, %v628_v20  ;;  %v190_v29 = vshll.u32 %v564_v28, %v187_v21  ;;  %v193_v31 = vshll.u32 %v565_v30, %v187_v21 }
  0xab   :  { %v196_v33 = vshll.u32 %v566_v32, %v187_v21  ;;  %v199_v38 = vshll.u32 %v567_v36, %v187_v21  ;;  %v202_v41 = vshll.u32 %v568_v39, %v187_v21  ;;  %vm205_vm2 = vcmp.lt.s32.totalorder %v186_v22, 1 }
  0xac   :  { %v191_v34 = vshrl.u32 %v565_v30, %v188_v24  ;;  %v194_v35 = vshrl.u32 %v566_v32, %v188_v24  ;;  %v197_v37 = vshrl.u32 %v567_v36, %v188_v24  ;;  %v200_v40 = vshrl.u32 %v568_v39, %v188_v24 }
  0xad   :  { %v203_v43 = vshrl.u32 %v569_v42, %v188_v24  ;;  %v189_v44 = vshrl.u32 %v564_v28, %v188_v24  ;;  %vm207_vm3 = vcmp.lt.s32.totalorder %v186_v22, 3  ;;  %vm208_vm4 = vcmp.lt.s32.totalorder %v186_v22, 4 }
  0xae   :  { %v192_v45 = vor.u32 %v191_v34, %v190_v29  ;;  %v195_v46 = vor.u32 %v194_v35, %v193_v31  ;;  %v198_v47 = vor.u32 %v197_v37, %v196_v33  ;;  %v201_v48 = vor.u32 %v200_v40, %v199_v38 }
  0xaf   :  { %v204_v49 = vor.u32 %v203_v43, %v202_v41  ;;  %v87_v57 = vshrl.u32 %v565_v30, %v84_v27  ;;  %vm206_vm5 = vcmp.lt.s32.totalorder %v186_v22, 2  ;;  %v86_v60 = vshll.u32 %v564_v28, %v628_v20 }
  0xb0   :  { %v209_v50 = vsel %vm205_vm2, %v189_v44, %v192_v45  ;;  %v210_v51 = vsel %vm208_vm4, %v198_v47, 2102212464  ;;  %v213_v52 = vsel %vm205_vm2, %v192_v45, %v195_v46  ;;  %v217_v53 = vsel %vm205_vm2, %v195_v46, %v198_v47 }
  0xb1   :  { %v211_v54 = vsel %vm207_vm3, %v195_v46, %v210_v51  ;;  %v214_v55 = vsel %vm208_vm4, %v201_v48, 920167782  ;;  %v218_v56 = vsel %vm208_vm4, %v204_v49, 1326507024  ;;  %v89_v1 = vshll.u32 %v565_v30, %v628_v20 }
  0xb2   :  { %v215_v58 = vsel %vm207_vm3, %v198_v47, %v214_v55  ;;  %v219_v59 = vsel %vm207_vm3, %v201_v48, %v218_v56  ;;  %v212_v61 = vsel %vm206_vm5, %v209_v50, %v211_v54  ;;  %v88_v10 = vor.u32 %v87_v57, %v86_v60 }
  0xb3   :  { %v216_v62 = vsel %vm206_vm5, %v213_v52, %v215_v58  ;;  %v220_v0 = vsel %vm206_vm5, %v217_v53, %v219_v59  ;;  %v90_v11 = vshrl.u32 %v566_v32, %v84_v27  ;;  %v92_v12 = vshll.u32 %v566_v32, %v628_v20 }
  0xb4   :  { %v640_v4 = vmul.u32.u64.low %v632_v25, %v220_v0  ;;  %v641_v5 = vmul.u32.u64.high %v632_v25, %v220_v0, %v640_v4  ;;  %v644_v8 = vmul.u32.u64.low %v632_v25, %v216_v62  ;;  %v645_v9 = vmul.u32.u64.high %v632_v25, %v216_v62, %v644_v8 }
  0xb5   :  { %v93_v13 = vshrl.u32 %v567_v36, %v84_v27  ;;  %v85_v14 = vshrl.u32 %v564_v28, %v84_v27  ;;  %v95_v15 = vshll.u32 %v567_v36, %v628_v20  ;;  %v96_v16 = vshrl.u32 %v568_v39, %v84_v27 }
  0xb6   :  { %v99_v17 = vshrl.u32 %v569_v42, %v84_v27  ;;  %v228_v18 = vmul.u32 %v632_v25, %v212_v61  ;;  %v91_v19 = vor.u32 %v90_v11, %v89_v1  ;;  %v98_v22 = vshll.u32 %v568_v39, %v628_v20 }
  0xb7   :  { %v94_v21 = vor.u32 %v93_v13, %v92_v12  ;;  %vm230_vm6 = vc.u32 %v641_v5, %v644_v8  ;;  %v231_v24 = vadd.s32 1, %v645_v9  ;;  %v97_v29 = vor.u32 %v96_v16, %v95_v15 }
  0xb8   :  { %vm101_vm7 = vcmp.lt.s32.totalorder %v630_v23, 1  ;;  %v100_v30 = vor.u32 %v99_v17, %v98_v22  ;;  %vm103_vm8 = vcmp.lt.s32.totalorder %v630_v23, 3  ;;  %vm104_vm9 = vcmp.lt.s32.totalorder %v630_v23, 4 }
  0xb9   :  { %v109_v28 = vsel %vm101_vm7, %v88_v10, %v91_v19  ;;  %v232_v27 = vsel %vm230_vm6, %v231_v24, %v645_v9  ;;  %v106_v25 = vsel %vm104_vm9, %v94_v21, 2102212464  ;;  %v110_v31 = vsel %vm104_vm9, %v97_v29, 920167782 }
  0xba   :  { %v113_v32 = vsel %vm101_vm7, %v91_v19, %v94_v21  ;;  %v233_v33 = vadd.s32 %v232_v27, %v228_v18  ;;  %vm102_vm10 = vcmp.lt.s32.totalorder %v630_v23, 2  ;;  %v111_v20 = vsel %vm103_vm8, %v94_v21, %v110_v31 }
  0xbb   :  { %v114_v34 = vsel %vm104_vm9, %v100_v30, 1326507024  ;;  %v105_v35 = vsel %vm101_vm7, %v85_v14, %v88_v10  ;;  %v107_v36 = vsel %vm103_vm8, %v91_v19, %v106_v25  ;;  %v112_v37 = vsel %vm102_vm10, %v109_v28, %v111_v20 }
  0xbc   :  { %v115_v38 = vsel %vm103_vm8, %v97_v29, %v114_v34  ;;  %v234_v39 = vadd.s32 536870912, %v233_v33  ;;  %v659_v41 = vmul.u32.u64.low %v634_v26, %v112_v37  ;;  %v660_v42 = vmul.u32.u64.high %v634_v26, %v112_v37, %v659_v41 }
  0xbd   :  { %v116_v40 = vsel %vm102_vm10, %v113_v32, %v115_v38  ;;  %v108_v46 = vsel %vm102_vm10, %v105_v35, %v107_v36  ;;  %v229_v62 = vadd.s32 %v644_v8, %v641_v5  ;;  %vm265_vm5 = vweird.f32 %v618_v3 }
  0xbe   :  { %v663_v43 = vmul.u32.u64.low %v634_v26, %v116_v40  ;;  %v664_v44 = vmul.u32.u64.high %v634_v26, %v116_v40, %v663_v43  ;;  %v235_v45 = vshrl.u32 %v234_v39, 30  ;;  %v127_v23 = vadd.s32 1, %v660_v42 }
  0xbf   :  { %v124_v48 = vmul.u32 %v634_v26, %v108_v46  ;;  %vm161_vm9 = vweird.f32 %v616_v2 }
  0xc0   :  { %v236_v47 = vshll.u32 %v235_v45, 30  ;;  %vm126_vm11 = vc.u32 %v664_v44, %v659_v41  ;;  %v125_v19 = vadd.s32 %v659_v41, %v664_v44  ;;  %v259_v8 = vsub.s32 4, %v235_v45 }
  0xc1   :  { %v128_v50 = vsel %vm126_vm11, %v127_v23, %v660_v42 }
  0xc2   :  { %v237_v49 = vsub.s32 %v233_v33, %v236_v47  ;;  %v129_v51 = vadd.s32 %v128_v50, %v124_v48  ;;  %v260_v32 = vsel %vm175_vm14, %v259_v8, %v235_v45 }
  0xc3   :  { %v262_v34 = vsel %vm174_vm15, 0, %v260_v32 }
  0xc4   :  { %v239_v52 = vsub.s32 0, %v237_v49  ;;  %v130_v53 = vadd.s32 536870912, %v129_v51  ;;  %v266_v39 = vadd.s32 3, %v262_v34 }
  0xc6   :  { %v412_v54 = vmin.u32 %v239_v52, %v237_v49  ;;  %v131_v55 = vshrl.u32 %v130_v53, 30  ;;  %v267_v42 = vand.u32 3, %v266_v39 }
  0xc8   :  { %v241_v56 = vclz %v412_v54  ;;  %v132_v57 = vshll.u32 %v131_v55, 30  ;;  %v155_v38 = vsub.s32 4, %v131_v55  ;;  %vm272_vm2 = vcmp.eq.s32.totalorder %v267_v42, 2 }
  0xc9   :  { %vm269_vm3 = vcmp.eq.s32.totalorder %v267_v42, 0  ;;  %vm268_vm4 = vcmp.lt.s32.totalorder %v267_v42, 2 }
  0xca   :  { %v413_v58 = vadd.s32 4294967294, %v241_v56  ;;  %v133_v59 = vsub.s32 %v129_v51, %v132_v57  ;;  %v156_v41 = vsel %vm71_vm0, %v155_v38, %v131_v55 }
  0xcb   :  { %v158_v45 = vsel %vm70_vm1, 0, %v156_v41 }
  0xcc   :  { %vm414_vm12 = vcmp.lt.s32.totalorder %v413_v58, 0  ;;  %v135_v61 = vsub.s32 0, %v133_v59 }
  0xcd   :  { %v244_v60 = vsel %vm414_vm12, 0, %v413_v58 }
  0xce   :  { %v245_v26 = vsub.s32 32, %v244_v60  ;;  %v249_v0 = vsub.s32 4294967266, %v244_v60  ;;  %v408_v1 = vmin.u32 %v135_v61, %v133_v59  ;;  %v246_v4 = vshll.u32 %v237_v49, %v244_v60 }
  0xcf   :  { %v162_v49 = vadd.s32 3, %v158_v45 }
  0xd0   :  { %v247_v9 = vshrl.u32 %v229_v62, %v245_v26  ;;  %v250_v10 = vadd.s32 127, %v249_v0  ;;  %v137_v11 = vclz %v408_v1  ;;  %v416_v62 = vld [vmem:[%s702_s1 + $0x3] ss:$0 sm:$0xff] }
  0xd1   :  { %v163_v52 = vand.u32 3, %v162_v49 }
  0xd2   :  { %v248_v12 = vor.u32 %v247_v9, %v246_v4  ;;  %v251_v13 = vshll.u32 %v250_v10, 23  ;;  %v409_v14 = vadd.s32 4294967294, %v137_v11 }
  0xd3   :  { %vm168_vm6 = vcmp.eq.s32.totalorder %v163_v52, 2  ;;  %vm165_vm7 = vcmp.eq.s32.totalorder %v163_v52, 0  ;;  %vm164_vm8 = vcmp.lt.s32.totalorder %v163_v52, 2 }
  0xd4   :  { %v252_v15 = vor.u32 4788187, %v251_v13  ;;  %vm410_vm13 = vcmp.lt.s32.totalorder %v409_v14, 0  ;;  %v255_v17 = vcvt.s32.f32 %v248_v12 }
  0xd5   :  { %v140_v18 = vsel %vm410_vm13, 0, %v409_v14 }
  0xd6   :  { %v253_v16 = vand.u32 2147483647, %v252_v15  ;;  %v141_v21 = vsub.s32 32, %v140_v18  ;;  %v145_v22 = vsub.s32 4294967266, %v140_v18  ;;  %v142_v24 = vshll.u32 %v133_v59, %v140_v18 }
  0xd8   :  { %v256_v5 = vmul.f32 %v255_v17, %v253_v16  ;;  %v143_v29 = vshrl.u32 %v125_v19, %v141_v21  ;;  %v146_v30 = vadd.s32 127, %v145_v22 }
  0xda   :  { %v257_v28 = vxor.u32 2147483648, %v256_v5  ;;  %v144_v27 = vor.u32 %v143_v29, %v142_v24  ;;  %v147_v25 = vshll.u32 %v146_v30, 23 }
  0xdc   :  { %v258_v31 = vsel %vm175_vm14, %v257_v28, %v256_v5  ;;  %v148_v20 = vor.u32 4788187, %v147_v25  ;;  %v151_v36 = vcvt.s32.f32 %v144_v27 }
  0xdd   :  { %v261_v33 = vsel %vm174_vm15, %v618_v3, %v258_v31  ;;  %v415_v3 = vld [vmem:[%s702_s1 + $0x2] ss:$0 sm:$0xff] }
  0xde   :  { %504 = vcosq.f32 %v261_v33  ;;  %v149_v35 = vand.u32 2147483647, %v148_v20  ;;  %v281_v61 = vmul.f32 %v415_v3, %v612_v63 }
  0xdf   :  { %506 = vsinq.f32 %v261_v33 }
  0xe0   :  { %v152_v37 = vmul.f32 %v151_v36, %v149_v35  ;;  %v286_v1 = vadd.f32 %v416_v62, %v281_v61 }
  0xe2   :  { %v153_v40 = vxor.u32 2147483648, %v152_v37 }
  0xe4   :  { %v154_v6 = vsel %vm71_vm0, %v153_v40, %v152_v37 }
  0xe5   :  { %v157_v43 = vsel %vm70_vm1, %v616_v2, %v154_v6 }
  0xe6   :  { %508 = vcosq.f32 %v157_v43 }
  0xe7   :  { %510 = vsinq.f32 %v157_v43 }
  0xe8   :  { %v505_v44 = vpop.eup %504 }
  0xe9   :  { %v507_v46 = vpop.eup %506  ;;  %v273_v47 = vxor.u32 2147483648, %v505_v44 }
  0xea   :  { %v270_v23 = vxor.u32 2147483648, %v507_v46 }
  0xeb   :  { %v274_v48 = vsel %vm272_vm2, %v273_v47, %v507_v46 }
  0xec   :  { %v271_v50 = vsel %vm269_vm3, %v505_v44, %v270_v23 }
  0xed   :  { %v275_v7 = vsel %vm268_vm4, %v271_v50, %v274_v48 }
  0xee   :  { %v276_v51 = vsel %vm265_vm5, nan, %v275_v7 }
  0xef   :  { %383 = vmatprep.mubr.f32.mxu0 %v276_v51 }
  0xf0   :  { %v509_v53 = vpop.eup %508 }
  0xf1   :  { %v511_v54 = vpop.eup %510  ;;  %v169_v55 = vxor.u32 2147483648, %v509_v53 }
  0xf2   :  { %v166_v56 = vxor.u32 2147483648, %v511_v54 }
  0xf3   :  { %v170_v57 = vsel %vm168_vm6, %v169_v55, %v511_v54 }
  0xf4   :  { %v167_v58 = vsel %vm165_vm7, %v509_v53, %v166_v56 }
  0xf5   :  { %v171_v59 = vsel %vm164_vm8, %v167_v58, %v170_v57 }
  0xf6   :  { %v172_v60 = vsel %vm161_vm9, nan, %v171_v59 }
  0xf7   :  { %384 = vmatmul.mubr.f32.vlgmr.msra.gmra.mrb[0].mxu0 %v172_v60 }
 0x1ca   :  { %v449_v26 = vpop.f32.mrb[0].mxu0 }
 0x1cb   :  { %v450_v0 = vpop.f32.mrb[1].mxu0 }
 0x1cc   :  { %v451_v4 = vadd.f32 %v450_v0, %v449_v26 }
 0x1ce   :  { %v389_v2 = vadd.f32 %v451_v4, %v286_v1 }
 0x1d0   :  { %390 = vst [vmem:[#allocation5] sm:$0xff] %v389_v2 }
 0x1d1   :  { %545 = shalt.err (!%p542_p12)
}
 0x1d2   :  { %s546_s1 = scalar_lea.hbm %s704_s3, 128 }
 0x1d3   :  { %p547_p13 = scmp.ne.s32.totalorder %s704_s3, %s546_s1  ;;  %p550_p0 = scmp.lt.u32.totalorder %s546_s1, %s704_s3 }
 0x1d5   :  { %p552_p1 = pnand %p550_p0, %p547_p13 }
 0x1d7   :  { %555 = shalt.err (!%p552_p1)
}
 0x1d8   :  { %400 = dma.vmem_to_hbm [thread:$0]  %s398_s8, 128, %s704_s3, [#allocation4]  }
 0x1d9   :  { %558 = dma.done.wait [#allocation4], 128  }
 0x1da   :  { %559 = vsyncadd [#allocation4], 4294967168 }
 0x1db   :  { %404 = vsyncpa [#allocation3], 1 }
 0x1dc   :  { %405 = vsyncpa [#allocation4], 1 }

</bundles_post_ra>
